<compile_context>
chip_gen: v6e
topology: v6e:2x2x1
jax: 0.10.0
libtpu: 0.0.40
codegen_flags: <defaults>
</compile_context>

<pallas_src>
import functools

import jax
import jax.numpy as jnp
from jax.experimental import pallas as pl
from jax.experimental.pallas import tpu as pltpu

_NEG_INF = -1e30  # finite "minus infinity" for padded vocab columns


def _generator_kernel(x_ref, w_ref, b_ref, o_ref, m_ref, l_ref):
    # x_ref: (TM, D) compute dtype | w_ref: (D, TV) compute dtype
    # b_ref: (1, TV) f32           | o_ref: (TM, Vpad) out dtype (resident over j)
    # m_ref/l_ref: (TM, 1) f32 scratch -- running max / running sum(exp)
    j = pl.program_id(1)

    @pl.when(j == 0)
    def _init():
        m_ref[...] = jnp.full_like(m_ref, -jnp.inf)
        l_ref[...] = jnp.zeros_like(l_ref)

    # MXU matmul with native (bf16) operands, f32 accumulation.
    logits = jnp.dot(
        x_ref[...], w_ref[...], preferred_element_type=jnp.float32
    ) + b_ref[...]

    # Online (flash-style) log-sum-exp update, all in f32.
    m_prev = m_ref[...]
    m_new = jnp.maximum(m_prev, jnp.max(logits, axis=-1, keepdims=True))
    l_ref[...] = (
        l_ref[...] * jnp.exp(m_prev - m_new)
        + jnp.sum(jnp.exp(logits - m_new), axis=-1, keepdims=True)
    )
    m_ref[...] = m_new

    # Stash raw logits into the resident output block (lane-aligned slice).
    tv = logits.shape[-1]
    start = pl.multiple_of(j * tv, tv)
    o_ref[:, pl.ds(start, tv)] = logits.astype(o_ref.dtype)

    # Last vocab tile: normalize the whole row in place.
    @pl.when(j == pl.num_programs(1) - 1)
    def _finalize():
        norm = m_ref[...] + jnp.log(l_ref[...])
        o_ref[...] = (o_ref[...].astype(jnp.float32) - norm).astype(o_ref.dtype)


def _round_up(a, b):
    return (a + b - 1) // b * b


def _pick_tiles(num_tokens, vocab, out_bytes):
    # Vocab tile: lane/MXU aligned (multiple of 128; 512 preferred).
    tile_v = 512 if vocab > 512 else _round_up(vocab, 128)
    v_pad = _round_up(vocab, tile_v)
    # Token tile: as large as possible for MXU utilization, but keep the
    # resident (tile_m, v_pad) output block (x2 buffers) inside a conservative
    # budget so the same tiling also fits v7x's 64 MiB VMEM.
    budget = 24 * 1024 * 1024
    tile_m = 256
    while tile_m > 8 and 2 * tile_m * v_pad * out_bytes > budget:
        tile_m //= 2
    tile_m = min(tile_m, _round_up(num_tokens, 8))
    m_pad = _round_up(num_tokens, tile_m)
    return tile_m, tile_v, m_pad, v_pad


@functools.partial(jax.jit, static_argnames=("compute_dtype", "out_dtype"))
def generator_forward(x, w, b, *, compute_dtype=jnp.bfloat16, out_dtype=None):
    """log_softmax(x @ w + b, axis=-1).

    x: [B, S, d_model], w: [d_model, vocab], b: [vocab] -> [B, S, vocab].
    `compute_dtype` feeds the MXU (bf16 default); accumulation & softmax stay
    f32.  `out_dtype` defaults to x.dtype (pass bf16 to halve HBM writeback).
    """
    B, S, D = x.shape
    V = w.shape[1]
    out_dt = jnp.dtype(x.dtype if out_dtype is None else out_dtype)
    M = B * S

    tile_m, tile_v, m_pad, v_pad = _pick_tiles(M, V, out_dt.itemsize)

    x2d = x.reshape(M, D).astype(compute_dtype)
    if m_pad != M:
        x2d = jnp.pad(x2d, ((0, m_pad - M), (0, 0)))
    wc = w.astype(compute_dtype)
    bf = b.astype(jnp.float32)
    if v_pad != V:
        # Padded columns: zero weights + "-inf" bias so they never affect the
        # row max / sum(exp); sliced off below.
        wc = jnp.pad(wc, ((0, 0), (0, v_pad - V)))
        bf = jnp.pad(bf, (0, v_pad - V), constant_values=_NEG_INF)
    b2d = bf.reshape(1, v_pad)

    out = pl.pallas_call(
        _generator_kernel,
        out_shape=jax.ShapeDtypeStruct((m_pad, v_pad), out_dt),
        grid_spec=pltpu.PrefetchScalarGridSpec(
            num_scalar_prefetch=0,
            grid=(m_pad // tile_m, v_pad // tile_v),
            in_specs=[
                pl.BlockSpec((tile_m, D), lambda i, j: (i, 0)),   # token tile
                pl.BlockSpec((D, tile_v), lambda i, j: (0, j)),   # streamed weight
                pl.BlockSpec((1, tile_v), lambda i, j: (0, j)),   # bias tile
            ],
            # Output block is resident across the vocab axis; one HBM
            # writeback per token tile.
            out_specs=pl.BlockSpec((tile_m, v_pad), lambda i, j: (i, 0)),
            scratch_shapes=[
                pltpu.VMEM((tile_m, 1), jnp.float32),  # running max
                pltpu.VMEM((tile_m, 1), jnp.float32),  # running sum(exp)
            ],
        ),
        compiler_params=pltpu.CompilerParams(
            dimension_semantics=("parallel", "arbitrary"),
            vmem_limit_bytes=48 * 1024 * 1024,
        ),
    )(x2d, wc, b2d)

    return out[:M, :V].reshape(B, S, V)


def _reference(x, w, b):
    logits = jnp.einsum(
        "bsd,dv->bsv", x.astype(jnp.float32), w.astype(jnp.float32)
    ) + b.astype(jnp.float32)
    return jax.nn.log_softmax(logits, axis=-1)


if __name__ == "__main__":
    key = jax.random.PRNGKey(0)
    # VOCAB deliberately not a multiple of 128 to exercise padding + masking.
    B, S, D_MODEL, VOCAB = 2, 8, 32, 120

    kx, kw, kb = jax.random.split(key, 3)
    x = jax.random.normal(kx, (B, S, D_MODEL), dtype=jnp.float32)
    # Deterministic parameter init (mimics nn.Linear's uniform init scale).
    bound = 1.0 / (D_MODEL ** 0.5)
    w = jax.random.uniform(kw, (D_MODEL, VOCAB), jnp.float32, -bound, bound)
    b = jax.random.uniform(kb, (VOCAB,), jnp.float32, -bound, bound)

    ref = _reference(x, w, b)

    # f32 operand path: tight check against the reference.
    out_f32 = generator_forward(x, w, b, compute_dtype=jnp.float32)
    jax.block_until_ready(out_f32)
    assert out_f32.shape == (B, S, VOCAB)
    assert jnp.allclose(out_f32, ref, atol=1e-5, rtol=1e-5), "f32 path mismatch"
    assert jnp.allclose(jnp.sum(jnp.exp(out_f32), axis=-1), 1.0, atol=1e-5)

    # Default fast path: bf16 MXU operands, f32 accumulation / softmax.
    out_bf16 = generator_forward(x, w, b)
    jax.block_until_ready(out_bf16)
    assert out_bf16.shape == (B, S, VOCAB)
    assert jnp.allclose(out_bf16, ref, atol=3e-2, rtol=0.0), "bf16 path mismatch"
    assert jnp.allclose(jnp.sum(jnp.exp(out_bf16), axis=-1), 1.0, atol=1e-2)

    print("KERNEL_OK")
</pallas_src>

<mosaic_0001>
module attributes {stable_mosaic.version = 11 : i64} {
  func.func @_generator_kernel(%arg0: i32, %arg1: i32, %arg2: memref<16x32xf32, #tpu.memory_space<vmem>>, %arg3: memref<32x128xf32, #tpu.memory_space<vmem>>, %arg4: memref<1x128xf32, #tpu.memory_space<vmem>>, %arg5: memref<16x128xf32, #tpu.memory_space<vmem>>, %arg6: memref<16x1xf32, #tpu.memory_space<vmem>>, %arg7: memref<16x1xf32, #tpu.memory_space<vmem>>) attributes {dimension_semantics = [#tpu.dimension_semantics<parallel>, #tpu.dimension_semantics<arbitrary>], iteration_bounds = array<i64: 1, 1>, scalar_prefetch = 0 : i64, scratch_operands = 2 : i64, tpu.core_type = #tpu.core_type<tc>, window_params = [{transform_indices = @transform_0, window_bounds = array<i64: 16, 32>}, {transform_indices = @transform_1, window_bounds = array<i64: 32, 128>}, {transform_indices = @transform_2, window_bounds = array<i64: 1, 128>}, {transform_indices = @transform_3, window_bounds = array<i64: 16, 128>}]} {
    %c0_i32 = arith.constant 0 : i32
    %0 = arith.cmpi eq, %arg1, %c0_i32 : i32
    %1 = arith.extui %0 : i1 to i32
    %c0_i32_0 = arith.constant 0 : i32
    %2 = arith.cmpi ne, %1, %c0_i32_0 : i32
    scf.if %2 {
      %cst_19 = arith.constant 0xFF800000 : f32
      %32 = vector.broadcast %cst_19 : f32 to vector<16x1xf32>
      %c0_20 = arith.constant 0 : index
      %c0_21 = arith.constant 0 : index
      %33 = vector.load %arg6[%c0_20, %c0_21] : memref<16x1xf32, #tpu.memory_space<vmem>>, vector<16x1xf32>
      tpu.vector_store %arg6[%c0_20, %c0_21], %32 {strides = array<i32>} : memref<16x1xf32, #tpu.memory_space<vmem>>, vector<16x1xf32>,
      %cst_22 = arith.constant 0.000000e+00 : f32
      %34 = vector.broadcast %cst_22 : f32 to vector<16x1xf32>
      %c0_23 = arith.constant 0 : index
      %c0_24 = arith.constant 0 : index
      %35 = vector.load %arg7[%c0_23, %c0_24] : memref<16x1xf32, #tpu.memory_space<vmem>>, vector<16x1xf32>
      tpu.vector_store %arg7[%c0_23, %c0_24], %34 {strides = array<i32>} : memref<16x1xf32, #tpu.memory_space<vmem>>, vector<16x1xf32>,
    } else {
    }
    %c0 = arith.constant 0 : index
    %c0_1 = arith.constant 0 : index
    %3 = vector.load %arg2[%c0, %c0_1] : memref<16x32xf32, #tpu.memory_space<vmem>>, vector<16x32xf32>
    %c0_2 = arith.constant 0 : index
    %c0_3 = arith.constant 0 : index
    %4 = vector.load %arg3[%c0_2, %c0_3] : memref<32x128xf32, #tpu.memory_space<vmem>>, vector<32x128xf32>
    %cst = arith.constant dense<0.000000e+00> : vector<16x128xf32>
    %5 = tpu.matmul %3, %4, %cst {dimension_numbers = #tpu.dot_dimension_numbers<[1], [0], [0], [1], [0, 0, 1, 1], [], []>} : vector<16x32xf32>, vector<32x128xf32>, vector<16x128xf32> -> vector<16x128xf32>
    %c0_4 = arith.constant 0 : index
    %c0_5 = arith.constant 0 : index
    %6 = vector.load %arg4[%c0_4, %c0_5] : memref<1x128xf32, #tpu.memory_space<vmem>>, vector<1x128xf32>
    %7 = vector.broadcast %6 : vector<1x128xf32> to vector<16x128xf32>
    %8 = arith.addf %5, %7 : vector<16x128xf32>
    %c0_6 = arith.constant 0 : index
    %c0_7 = arith.constant 0 : index
    %9 = vector.load %arg6[%c0_6, %c0_7] : memref<16x1xf32, #tpu.memory_space<vmem>>, vector<16x1xf32>
    %cst_8 = arith.constant dense<0xFF800000> : vector<16xf32>
    %10 = vector.multi_reduction <maximumf>, %8, %cst_8 [1] : vector<16x128xf32> to vector<16xf32>
    %11 = vector.shape_cast %10 : vector<16xf32> to vector<16x1xf32>
    %12 = arith.maximumf %9, %11 : vector<16x1xf32>
    %c0_9 = arith.constant 0 : index
    %c0_10 = arith.constant 0 : index
    %13 = vector.load %arg7[%c0_9, %c0_10] : memref<16x1xf32, #tpu.memory_space<vmem>>, vector<16x1xf32>
    %14 = arith.subf %9, %12 : vector<16x1xf32>
    %15 = math.exp %14 : vector<16x1xf32>
    %16 = arith.mulf %13, %15 : vector<16x1xf32>
    %17 = vector.broadcast %12 : vector<16x1xf32> to vector<16x128xf32>
    %18 = arith.subf %8, %17 : vector<16x128xf32>
    %19 = math.exp %18 : vector<16x128xf32>
    %cst_11 = arith.constant dense<0.000000e+00> : vector<16xf32>
    %20 = vector.multi_reduction <add>, %19, %cst_11 [1] : vector<16x128xf32> to vector<16xf32>
    %21 = vector.shape_cast %20 : vector<16xf32> to vector<16x1xf32>
    %22 = arith.addf %16, %21 : vector<16x1xf32>
    %c0_12 = arith.constant 0 : index
    %c0_13 = arith.constant 0 : index
    %23 = vector.load %arg7[%c0_12, %c0_13] : memref<16x1xf32, #tpu.memory_space<vmem>>, vector<16x1xf32>
    tpu.vector_store %arg7[%c0_12, %c0_13], %22 {strides = array<i32>} : memref<16x1xf32, #tpu.memory_space<vmem>>, vector<16x1xf32>,
    %c0_14 = arith.constant 0 : index
    %c0_15 = arith.constant 0 : index
    %24 = vector.load %arg6[%c0_14, %c0_15] : memref<16x1xf32, #tpu.memory_space<vmem>>, vector<16x1xf32>
    tpu.vector_store %arg6[%c0_14, %c0_15], %12 {strides = array<i32>} : memref<16x1xf32, #tpu.memory_space<vmem>>, vector<16x1xf32>,
    %c128_i32 = arith.constant 128 : i32
    %25 = arith.muli %arg1, %c128_i32 : i32
    %26 = tpu.assume_multiple %25, 128 : i32
    %c0_16 = arith.constant 0 : index
    %27 = arith.index_cast %26 : i32 to index
    %28 = vector.load %arg5[%c0_16, %27] : memref<16x128xf32, #tpu.memory_space<vmem>>, vector<16x128xf32>
    tpu.vector_store %arg5[%c0_16, %27], %8 {strides = array<i32>} : memref<16x128xf32, #tpu.memory_space<vmem>>, vector<16x128xf32>,
    %c0_i32_17 = arith.constant 0 : i32
    %29 = arith.cmpi eq, %arg1, %c0_i32_17 : i32
    %30 = arith.extui %29 : i1 to i32
    %c0_i32_18 = arith.constant 0 : i32
    %31 = arith.cmpi ne, %30, %c0_i32_18 : i32
    scf.if %31 {
      %c0_19 = arith.constant 0 : index
      %c0_20 = arith.constant 0 : index
      %32 = vector.load %arg6[%c0_19, %c0_20] : memref<16x1xf32, #tpu.memory_space<vmem>>, vector<16x1xf32>
      %c0_21 = arith.constant 0 : index
      %c0_22 = arith.constant 0 : index
      %33 = vector.load %arg7[%c0_21, %c0_22] : memref<16x1xf32, #tpu.memory_space<vmem>>, vector<16x1xf32>
      %34 = math.log %33 : vector<16x1xf32>
      %35 = arith.addf %32, %34 : vector<16x1xf32>
      %c0_23 = arith.constant 0 : index
      %c0_24 = arith.constant 0 : index
      %36 = vector.load %arg5[%c0_23, %c0_24] : memref<16x128xf32, #tpu.memory_space<vmem>>, vector<16x128xf32>
      %37 = vector.broadcast %35 : vector<16x1xf32> to vector<16x128xf32>
      %38 = arith.subf %36, %37 : vector<16x128xf32>
      %c0_25 = arith.constant 0 : index
      %c0_26 = arith.constant 0 : index
      %39 = vector.load %arg5[%c0_25, %c0_26] : memref<16x128xf32, #tpu.memory_space<vmem>>, vector<16x128xf32>
      tpu.vector_store %arg5[%c0_25, %c0_26], %38 {strides = array<i32>} : memref<16x128xf32, #tpu.memory_space<vmem>>, vector<16x128xf32>,
    } else {
    }
    return
  }
  func.func @transform_0(%arg0: i32, %arg1: i32) -> (i32, i32) {
    %c0_i32 = arith.constant 0 : i32
    %c0_i32_0 = arith.constant 0 : i32
    return %arg0, %c0_i32 : i32, i32
  }
  func.func @transform_1(%arg0: i32, %arg1: i32) -> (i32, i32) {
    %c0_i32 = arith.constant 0 : i32
    %c0_i32_0 = arith.constant 0 : i32
    return %c0_i32, %arg1 : i32, i32
  }
  func.func @transform_2(%arg0: i32, %arg1: i32) -> (i32, i32) {
    %c0_i32 = arith.constant 0 : i32
    %c0_i32_0 = arith.constant 0 : i32
    return %c0_i32, %arg1 : i32, i32
  }
  func.func @transform_3(%arg0: i32, %arg1: i32) -> (i32, i32) {
    %c0_i32 = arith.constant 0 : i32
    %c0_i32_0 = arith.constant 0 : i32
    return %arg0, %c0_i32 : i32, i32
  }
}

</mosaic_0001>

<bundles_post_ra>
// kernel: generator_forward.1
= control target key start
LH: loop header
LB: loop body
LE: loop exit
PB: predicated region body
PF: predicated region fallthrough
CT: control target
= control target key end

     0   :  { %vm36_vm0 = vcmask 261120   ;;  %vm18_vm1 = vcmask 7168   ;;  %v240_v6 = vmov -inf   ;;  %v241_v12 = vmov 0   ;;  %s310_s1 = inlined_call_operand.vmem [shape: f32[32,128], index: 1, kind: input, shape index: {}]   ;;  %s311_s0 = inlined_call_operand.vmem [shape: f32[16,32], index: 0, kind: input, shape index: {}]   ;;  %s312_s2 = inlined_call_operand.vmem [shape: f32[1,128], index: 2, kind: input, shape index: {}]   ;;  %s313_s3 = inlined_call_operand.vmem [shape: f32[16,128], index: 3, kind: output, shape index: {}]  }
   0x1   :  { %v28_v0 = vld [vmem:[%s310_s1 + $0x18] sm:$0xff]  ;;  %v27_v1 = vld [vmem:[%s310_s1 + $0x10] sm:$0xff]  ;;  %v23_v2 = vld [vmem:[%s311_s0] sm:$0xff]  ;;  %19 = vst.msk [vmem:[#allocation2] sm:$0xff] %vm18_vm1, %v240_v6  ;;  %226 = vset.pattern.permute.xlu1 %v241_v12  ;;  %227 = vset.pattern.permute.xlu0 %v241_v12  ;;  %v242_v13 = vmov 0.0  }
   0x2   :  { %212 = vmatprep.subr.mxu0 %v28_v0  ;;  %v26_v3 = vld [vmem:[%s310_s1 + $0x8] sm:$0xff]  ;;  %220 = vmatprep.mubr.msk.f32.mxu0 %vm36_vm0, %v23_v2  ;;  %v25_v4 = vld [vmem:[%s310_s1] sm:$0xff]  ;;  %20 = vst.msk [vmem:[#allocation2 + $0x8] sm:$0xff] %vm18_vm1, %v240_v6  ;;  %21 = vst.msk [vmem:[#allocation3] sm:$0xff] %vm18_vm1, %v242_v13 }
   0x3   :  { %213 = vmatpush3.msra.mxu0 %v28_v0  ;;  %v24_v5 = vld [vmem:[%s311_s0 + $0x8] sm:$0xff]  ;;  %v203_v8 = vld [vmem:[%s312_s2] ss:$0 sm:$0xff]  ;;  %22 = vst.msk [vmem:[#allocation3 + $0x8] sm:$0xff] %vm18_vm1, %v242_v13 }
   0x4   :  { %214 = vmatprep.subr.mxu0 %v27_v1 }
   0x5   :  { %215 = vmatpush3.msra.mxu0 %v27_v1 }
   0x6   :  { %216 = vmatprep.subr.mxu0 %v26_v3 }
   0x7   :  { %217 = vmatpush3.msra.mxu0 %v26_v3 }
   0x8   :  { %218 = vmatprep.subr.mxu0 %v25_v4  ;;  %v118_v14 = vld [vmem:[#allocation2] sm:$0xff] }
   0x9   :  { %219 = vmatpush3.msra.mxu0 %v25_v4  ;;  %v119_v17 = vld [vmem:[#allocation2 + $0x8] sm:$0xff]  ;;  %v126_v33 = vld [vmem:[#allocation3] sm:$0xff] }
   0xa   :  { %221 = vmatmul.mubr.msk.f32.vlgmr.msra.gmra.mxu0 %vm36_vm0, %v24_v5  ;;  %v127_v37 = vld [vmem:[#allocation3 + $0x8] sm:$0xff] }
  0xca   :  { %v222_v7 = vpop.f32.mrf.mxu0 }
  0xcb   :  { %v291_v11 = vadd.f32 %v222_v7, %v203_v8 }
  0xcc   :  { %v109_v9 = vpop.f32.mrf.mxu0 }
  0xcd   :  { %v288_v10 = vadd.f32 %v203_v8, %v109_v9 }
  0xcf   :  { %120 = vmax.xlane.f32.xlu0 %v288_v10 }
  0xd3   :  { %122 = vmax.xlane.f32.xlu0 %v291_v11 }
 0x158   :  { %v121_v15 = vpop.xlane.xlu0 %120 }
 0x159   :  { %v124_v16 = vmax.f32 %v118_v14, %v121_v15 }
 0x15b   :  { %v128_v18 = vsub.f32 %v118_v14, %v124_v16  ;;  %161 = vst.msk [vmem:[#allocation2] sm:$0xff] %vm18_vm1, %v124_v16  ;;  %138 = vperm.xlu1 %226, %v124_v16  }
 0x15c   :  { %v123_v19 = vpop.xlane.xlu0 %122 }
 0x15d   :  { %v125_v20 = vmax.f32 %v119_v17, %v123_v19  ;;  %v130_v30 = vmul.f32 1.442695, %v128_v18 }
 0x15f   :  { %v129_v21 = vsub.f32 %v119_v17, %v125_v20  ;;  %162 = vst.msk [vmem:[#allocation2 + $0x8] sm:$0xff] %vm18_vm1, %v125_v20  ;;  %143 = vperm.xlu1 %226, %v125_v20  }
 0x161   :  { %v132_v31 = vmul.f32 1.442695, %v129_v21 }
 0x162   :  { %v172_v46 = vld [vmem:[#allocation2] sm:$0xff] }
 0x166   :  { %v173_v50 = vld [vmem:[#allocation2 + $0x8] sm:$0xff] }
 0x1d6   :  { %v139_v22 = vpop.permute.xlu1 %138 }
 0x1d7   :  { %v146_v23 = vsub.f32 %v288_v10, %v139_v22 }
 0x1d9   :  { %v148_v24 = vmul.f32 1.442695, %v146_v23 }
 0x1da   :  { %v144_v25 = vpop.permute.xlu1 %143 }
 0x1db   :  { %228 = vpow2.f32 %v148_v24  ;;  %v147_v26 = vsub.f32 %v291_v11, %v144_v25 }
 0x1dd   :  { %v150_v27 = vmul.f32 1.442695, %v147_v26 }
 0x1df   :  { %230 = vpow2.f32 %v150_v27 }
 0x1e0   :  { %232 = vpow2.f32 %v130_v30 }
 0x1e1   :  { %234 = vpow2.f32 %v132_v31 }
 0x1e8   :  { %v229_v28 = vpop.eup %228 }
 0x1e9   :  { %152 = vadd.xlane.f32.xlu0 %v229_v28 }
 0x1ec   :  { %v231_v29 = vpop.eup %230 }
 0x1ed   :  { %154 = vadd.xlane.f32.xlu1 %v231_v29  ;;  %v233_v32 = vpop.eup %232 }
 0x1ee   :  { %v134_v34 = vmul.f32 %v233_v32, %v126_v33  ;;  %v235_v35 = vpop.eup %234 }
 0x1ef   :  { %v135_v39 = vmul.f32 %v235_v35, %v127_v37 }
 0x272   :  { %v153_v36 = vpop.xlane.xlu0 %152 }
 0x273   :  { %v156_v38 = vadd.f32 %v153_v36, %v134_v34 }
 0x275   :  { %159 = vst.msk [vmem:[#allocation3] sm:$0xff] %vm18_vm1, %v156_v38 }
 0x276   :  { %v155_v40 = vpop.xlane.xlu1 %154 }
 0x277   :  { %v157_v41 = vadd.f32 %v155_v40, %v135_v39 }
 0x279   :  { %160 = vst.msk [vmem:[#allocation3 + $0x8] sm:$0xff] %vm18_vm1, %v157_v41 }
 0x27c   :  { %v174_v42 = vld [vmem:[#allocation3] sm:$0xff] }
 0x27d   :  { %236 = vlog2.f32 %v174_v42 }
 0x280   :  { %v175_v43 = vld [vmem:[#allocation3 + $0x8] sm:$0xff] }
 0x281   :  { %238 = vlog2.f32 %v175_v43 }
 0x28a   :  { %v237_v44 = vpop.eup %236 }
 0x28b   :  { %v177_v45 = vmul.f32 0.6931472, %v237_v44 }
 0x28d   :  { %v180_v47 = vadd.f32 %v177_v45, %v172_v46 }
 0x28e   :  { %v239_v48 = vpop.eup %238 }
 0x28f   :  { %186 = vperm.xlu0 %227, %v180_v47   ;;  %v179_v49 = vmul.f32 0.6931472, %v239_v48 }
 0x291   :  { %v181_v51 = vadd.f32 %v179_v49, %v173_v50 }
 0x293   :  { %191 = vperm.xlu1 %226, %v181_v51  }
 0x30a   :  { %v187_v52 = vpop.permute.xlu0 %186 }
 0x30b   :  { %v194_v53 = vsub.f32 %v288_v10, %v187_v52 }
 0x30d   :  { %196 = vst [vmem:[%s313_s3] sm:$0xff] %v194_v53 }
 0x30e   :  { %v192_v54 = vpop.permute.xlu1 %191 }
 0x30f   :  { %v195_v55 = vsub.f32 %v291_v11, %v192_v54 }
 0x311   :  { %197 = vst [vmem:[%s313_s3 + $0x8] sm:$0xff] %v195_v55 }

</bundles_post_ra>
